<compile_context>
chip_gen: v7x
topology: tpu7x:2x2x1
jax: 0.10.0
libtpu: 0.0.40
codegen_flags: <defaults>
</compile_context>

<pallas_src>
import functools

import jax
import jax.numpy as jnp
from jax import lax
from jax.experimental import pallas as pl
from jax.experimental.pallas import tpu as pltpu


def _rup(x, m):
    return (x + m - 1) // m * m


def _tile_bytes(shape, itemsize):
    """Approximate VMEM footprint: lane dim padded to 128, sublane dim padded
    to the dtype's sublane packing (8 rows for 4-byte, 16 for 2-byte)."""
    sub = {4: 8, 2: 16, 1: 32}.get(itemsize, 8)
    dims = list(shape)
    dims[-1] = _rup(dims[-1], 128)
    if len(dims) >= 2:
        dims[-2] = _rup(dims[-2], sub)
    total = itemsize
    for d in dims:
        total *= d
    return total


def _vmem_budget():
    cap = 64 * 1024 * 1024          # conservative default (v7x per-core VMEM)
    try:
        info_cap = getattr(pltpu.get_tpu_info(), "vmem_capacity_bytes", None)
        if info_cap:
            cap = int(info_cap)
    except Exception:               # query unavailable: keep safe default
        pass
    return int(cap * 0.65)          # headroom for compiler-internal scratch


def _conv_relu_kernel(x_ref, w_ref, o_ref, xpad_ref, col_ref, acc_ref, *,
                      h, w, p, s, kh, kw, wp, span_c, ho_out, wo_out):
    """One batch-tile of images per grid step.

    x_ref   : (bt, Cin, H*W)           f32   raw (unpadded) images
    w_ref   : (Cout, Cin*KH*KW)        bf16  w[o, (i*KW+j)*Cin + c]
    o_ref   : (bt, Cout, Ho*Wo)              flattened NCHW output
    xpad_ref: (Cin, flatlen)           bf16  zero-padded flat image scratch
    col_ref : (Cin*KH*KW, bt*span_c)   bf16  im2col slab
    acc_ref : (Cout, bt*span_c)        f32   matmul accumulator
    """
    bt, cin, _ = x_ref.shape

    # Padding borders / alignment tail stay zero; interiors get overwritten.
    xpad_ref[...] = jnp.zeros_like(xpad_ref)

    for b in range(bt):
        # Paste image b into the interior of the padded scratch (cast -> bf16).
        for r in range(h):
            xpad_ref[:, pl.ds((r + p) * wp + p, w)] = (
                x_ref[b, :, pl.ds(r * w, w)].astype(xpad_ref.dtype))
        # im2col: one lane-shifted copy of the flat padded image per tap.
        for idx in range(kh * kw):
            i, j = divmod(idx, kw)
            col_ref[pl.ds(idx * cin, cin), pl.ds(b * span_c, span_c)] = (
                xpad_ref[:, pl.ds(i * wp + j, span_c)])

    # Single fused matmul over K = Cin*KH*KW (bf16 operands, f32 MXU acc).
    acc_ref[...] = jnp.dot(w_ref[...], col_ref[...],
                           preferred_element_type=jnp.float32)

    # ReLU + crop the valid (strided) columns directly into flattened NCHW.
    for b in range(bt):
        for ho in range(ho_out):
            q0 = b * span_c + ho * s * wp
            row = (acc_ref[:, pl.ds(q0, wo_out)] if s == 1
                   else acc_ref[:, pl.ds(q0, wo_out, s)])
            o_ref[b, :, pl.ds(ho * wo_out, wo_out)] = (
                jnp.maximum(row, 0.0).astype(o_ref.dtype))


@functools.partial(jax.jit, static_argnames=("stride", "padding"))
def conv_relu_forward(x_nchw, weight_oikk, *, stride=1, padding=0):
    """Conv2d(bias=False, stride, padding) + ReLU.

    x: (N, Cin, H, W), weight: (Cout, Cin, KH, KW) -> (N, Cout, Ho, Wo).
    """
    n, cin, h, w = x_nchw.shape
    cout, cin_w, kh, kw = weight_oikk.shape
    assert cin == cin_w, (cin, cin_w)
    s, p = int(stride), int(padding)
    assert s >= 1 and p >= 0

    hp, wp = h + 2 * p, w + 2 * p
    assert hp >= kh and wp >= kw
    ho_out, wo_out = (hp - kh) // s + 1, (wp - kw) // s + 1
    ho1, wo1 = hp - kh + 1, wp - kw + 1            # stride-1 extents
    span = (ho1 - 1) * wp + wo1                    # valid stride-1 flat cols
    span_c = _rup(span, 128)                       # lane-aligned matmul cols
    kk = cin * kh * kw
    flatlen = _rup(max(hp * wp, (kh - 1) * wp + (kw - 1) + span_c), 128)

    # Free layout glue only (reshape of a contiguous array is a bitcast); the
    # activation itself is NOT padded/cast/copied in the wrapper.
    x_flat = x_nchw.reshape(n, cin, h * w)
    w_flat = jnp.transpose(weight_oikk, (0, 2, 3, 1)).reshape(cout, kk)
    w_flat = w_flat.astype(jnp.bfloat16)

    x_isize = jnp.dtype(x_nchw.dtype).itemsize
    o_isize = x_isize

    def vmem_need(bt):
        return (2 * _tile_bytes((bt, cin, h * w), x_isize)               # x
                + 2 * _tile_bytes((cout, kk), 2)                         # w
                + 2 * _tile_bytes((bt, cout, ho_out * wo_out), o_isize)  # out
                + _tile_bytes((cin, flatlen), 2)                         # xpad
                + _tile_bytes((kk, bt * span_c), 2)                      # col
                + _tile_bytes((cout, bt * span_c), 4))                   # acc

    vmem_budget = _vmem_budget()
    bt = None
    for d in sorted((d for d in range(1, n + 1) if n % d == 0), reverse=True):
        if n // d >= min(2, n) and vmem_need(d) <= vmem_budget:
            bt = d
            break
    if bt is None:
        # TODO(synk): halo'd output-row tiling (second "parallel" grid axis
        # with overlapping input blocks) for feature maps whose padded image
        # + im2col slab exceed VMEM (hits earliest on v7x's 64 MiB/TC).
        raise ValueError("feature map too large for whole-image tiling")

    kernel = functools.partial(
        _conv_relu_kernel, h=h, w=w, p=p, s=s, kh=kh, kw=kw, wp=wp,
        span_c=span_c, ho_out=ho_out, wo_out=wo_out)

    out_flat = pl.pallas_call(
        kernel,
        out_shape=jax.ShapeDtypeStruct((n, cout, ho_out * wo_out),
                                       x_nchw.dtype),
        grid_spec=pltpu.PrefetchScalarGridSpec(
            num_scalar_prefetch=0,
            grid=(n // bt,),
            in_specs=[
                pl.BlockSpec((bt, cin, h * w), lambda g: (g, 0, 0)),
                # TODO(synk): single-buffer this constant weight block via
                # pipeline_mode=pl.Buffered(1) once verified on this jax
                # version (saves one duplicate weight copy in VMEM).
                pl.BlockSpec((cout, kk), lambda g: (0, 0)),
            ],
            out_specs=pl.BlockSpec((bt, cout, ho_out * wo_out),
                                   lambda g: (g, 0, 0)),
            scratch_shapes=[
                pltpu.VMEM((cin, flatlen), jnp.bfloat16),       # padded image
                pltpu.VMEM((kk, bt * span_c), jnp.bfloat16),    # im2col slab
                pltpu.VMEM((cout, bt * span_c), jnp.float32),   # accumulator
            ]),
        compiler_params=pltpu.CompilerParams(
            dimension_semantics=("parallel",),
            vmem_limit_bytes=vmem_budget),
    )(x_flat, w_flat)

    return out_flat.reshape(n, cout, ho_out, wo_out)


if __name__ == "__main__":
    # conv_relu(4, 8, kernel_size=3, stride=1, padding=1) on (2, 4, 16, 16).
    N, CIN, H, W = 2, 4, 16, 16
    COUT, KH, KW = 8, 3, 3
    STRIDE, PADDING = 1, 1

    key = jax.random.PRNGKey(0)
    kx, kw_key = jax.random.split(key)
    x = jax.random.normal(kx, (N, CIN, H, W), dtype=jnp.float32)
    fan_in = CIN * KH * KW
    weight = jax.random.normal(kw_key, (COUT, CIN, KH, KW),
                               dtype=jnp.float32) * (2.0 / fan_in) ** 0.5

    out = conv_relu_forward(x, weight, stride=STRIDE, padding=PADDING)
    out = jax.block_until_ready(out)

    # Reference 1: XLA conv+relu on the same bf16-rounded operands (f32 acc).
    xb = x.astype(jnp.bfloat16).astype(jnp.float32)
    wb = weight.astype(jnp.bfloat16).astype(jnp.float32)
    ref = jnp.maximum(lax.conv_general_dilated(
        xb, wb, window_strides=(STRIDE, STRIDE),
        padding=((PADDING, PADDING), (PADDING, PADDING)),
        dimension_numbers=("NCHW", "OIHW", "NCHW")), 0.0)
    assert out.shape == ref.shape == (N, COUT, H, W), out.shape
    assert float(jnp.max(jnp.abs(out - ref))) < 1e-3

    # Reference 2: full-f32 conv+relu (looser tol: bf16 operand rounding).
    ref32 = jnp.maximum(lax.conv_general_dilated(
        x, weight, window_strides=(STRIDE, STRIDE),
        padding=((PADDING, PADDING), (PADDING, PADDING)),
        dimension_numbers=("NCHW", "OIHW", "NCHW")), 0.0)
    assert float(jnp.max(jnp.abs(out - ref32))) < 1e-1

    print("KERNEL_OK")
</pallas_src>

<mosaic_0001>
module attributes {stable_mosaic.version = 11 : i64} {
  func.func @_conv_relu_kernel(%arg0: i32, %arg1: memref<1x4x256xf32, #tpu.memory_space<vmem>>, %arg2: memref<8x36xbf16, #tpu.memory_space<vmem>>, %arg3: memref<1x8x256xf32, #tpu.memory_space<vmem>>, %arg4: memref<4x512xbf16, #tpu.memory_space<vmem>>, %arg5: memref<36x384xbf16, #tpu.memory_space<vmem>>, %arg6: memref<8x384xf32, #tpu.memory_space<vmem>>) attributes {dimension_semantics = [#tpu.dimension_semantics<parallel>], iteration_bounds = array<i64: 2>, scalar_prefetch = 0 : i64, scratch_operands = 3 : i64, tpu.core_type = #tpu.core_type<tc>, window_params = [{transform_indices = @transform_0, window_bounds = array<i64: 1, 4, 256>}, {pipeline_mode = #tpu.pipeline_mode<synchronous>, transform_indices = @transform_1, window_bounds = array<i64: 8, 36>}, {transform_indices = @transform_2, window_bounds = array<i64: 1, 8, 256>}]} {
    %cst = arith.constant 0.000000e+00 : bf16
    %0 = vector.broadcast %cst : bf16 to vector<4x512xbf16>
    %c0 = arith.constant 0 : index
    %c0_0 = arith.constant 0 : index
    %1 = vector.load %arg4[%c0, %c0_0] : memref<4x512xbf16, #tpu.memory_space<vmem>>, vector<4x512xbf16>
    tpu.vector_store %arg4[%c0, %c0_0], %0 {strides = array<i32>} : memref<4x512xbf16, #tpu.memory_space<vmem>>, vector<4x512xbf16>,
    %c0_1 = arith.constant 0 : index
    %c0_2 = arith.constant 0 : index
    %c0_3 = arith.constant 0 : index
    %2 = vector.load %arg1[%c0_1, %c0_2, %c0_3] : memref<1x4x256xf32, #tpu.memory_space<vmem>>, vector<1x4x16xf32>
    %3 = vector.shape_cast %2 : vector<1x4x16xf32> to vector<4x16xf32>
    %4 = arith.truncf %3 : vector<4x16xf32> to vector<4x16xbf16>
    %c0_4 = arith.constant 0 : index
    %c19 = arith.constant 19 : index
    %5 = vector.load %arg4[%c0_4, %c19] : memref<4x512xbf16, #tpu.memory_space<vmem>>, vector<4x16xbf16>
    tpu.vector_store %arg4[%c0_4, %c19], %4 {strides = array<i32>} : memref<4x512xbf16, #tpu.memory_space<vmem>>, vector<4x16xbf16>,
    %c0_5 = arith.constant 0 : index
    %c0_6 = arith.constant 0 : index
    %c16 = arith.constant 16 : index
    %6 = vector.load %arg1[%c0_5, %c0_6, %c16] : memref<1x4x256xf32, #tpu.memory_space<vmem>>, vector<1x4x16xf32>
    %7 = vector.shape_cast %6 : vector<1x4x16xf32> to vector<4x16xf32>
    %8 = arith.truncf %7 : vector<4x16xf32> to vector<4x16xbf16>
    %c0_7 = arith.constant 0 : index
    %c37 = arith.constant 37 : index
    %9 = vector.load %arg4[%c0_7, %c37] : memref<4x512xbf16, #tpu.memory_space<vmem>>, vector<4x16xbf16>
    tpu.vector_store %arg4[%c0_7, %c37], %8 {strides = array<i32>} : memref<4x512xbf16, #tpu.memory_space<vmem>>, vector<4x16xbf16>,
    %c0_8 = arith.constant 0 : index
    %c0_9 = arith.constant 0 : index
    %c32 = arith.constant 32 : index
    %10 = vector.load %arg1[%c0_8, %c0_9, %c32] : memref<1x4x256xf32, #tpu.memory_space<vmem>>, vector<1x4x16xf32>
    %11 = vector.shape_cast %10 : vector<1x4x16xf32> to vector<4x16xf32>
    %12 = arith.truncf %11 : vector<4x16xf32> to vector<4x16xbf16>
    %c0_10 = arith.constant 0 : index
    %c55 = arith.constant 55 : index
    %13 = vector.load %arg4[%c0_10, %c55] : memref<4x512xbf16, #tpu.memory_space<vmem>>, vector<4x16xbf16>
    tpu.vector_store %arg4[%c0_10, %c55], %12 {strides = array<i32>} : memref<4x512xbf16, #tpu.memory_space<vmem>>, vector<4x16xbf16>,
    %c0_11 = arith.constant 0 : index
    %c0_12 = arith.constant 0 : index
    %c48 = arith.constant 48 : index
    %14 = vector.load %arg1[%c0_11, %c0_12, %c48] : memref<1x4x256xf32, #tpu.memory_space<vmem>>, vector<1x4x16xf32>
    %15 = vector.shape_cast %14 : vector<1x4x16xf32> to vector<4x16xf32>
    %16 = arith.truncf %15 : vector<4x16xf32> to vector<4x16xbf16>
    %c0_13 = arith.constant 0 : index
    %c73 = arith.constant 73 : index
    %17 = vector.load %arg4[%c0_13, %c73] : memref<4x512xbf16, #tpu.memory_space<vmem>>, vector<4x16xbf16>
    tpu.vector_store %arg4[%c0_13, %c73], %16 {strides = array<i32>} : memref<4x512xbf16, #tpu.memory_space<vmem>>, vector<4x16xbf16>,
    %c0_14 = arith.constant 0 : index
    %c0_15 = arith.constant 0 : index
    %c64 = arith.constant 64 : index
    %18 = vector.load %arg1[%c0_14, %c0_15, %c64] : memref<1x4x256xf32, #tpu.memory_space<vmem>>, vector<1x4x16xf32>
    %19 = vector.shape_cast %18 : vector<1x4x16xf32> to vector<4x16xf32>
    %20 = arith.truncf %19 : vector<4x16xf32> to vector<4x16xbf16>
    %c0_16 = arith.constant 0 : index
    %c91 = arith.constant 91 : index
    %21 = vector.load %arg4[%c0_16, %c91] : memref<4x512xbf16, #tpu.memory_space<vmem>>, vector<4x16xbf16>
    tpu.vector_store %arg4[%c0_16, %c91], %20 {strides = array<i32>} : memref<4x512xbf16, #tpu.memory_space<vmem>>, vector<4x16xbf16>,
    %c0_17 = arith.constant 0 : index
    %c0_18 = arith.constant 0 : index
    %c80 = arith.constant 80 : index
    %22 = vector.load %arg1[%c0_17, %c0_18, %c80] : memref<1x4x256xf32, #tpu.memory_space<vmem>>, vector<1x4x16xf32>
    %23 = vector.shape_cast %22 : vector<1x4x16xf32> to vector<4x16xf32>
    %24 = arith.truncf %23 : vector<4x16xf32> to vector<4x16xbf16>
    %c0_19 = arith.constant 0 : index
    %c109 = arith.constant 109 : index
    %25 = vector.load %arg4[%c0_19, %c109] : memref<4x512xbf16, #tpu.memory_space<vmem>>, vector<4x16xbf16>
    tpu.vector_store %arg4[%c0_19, %c109], %24 {strides = array<i32>} : memref<4x512xbf16, #tpu.memory_space<vmem>>, vector<4x16xbf16>,
    %c0_20 = arith.constant 0 : index
    %c0_21 = arith.constant 0 : index
    %c96 = arith.constant 96 : index
    %26 = vector.load %arg1[%c0_20, %c0_21, %c96] : memref<1x4x256xf32, #tpu.memory_space<vmem>>, vector<1x4x16xf32>
    %27 = vector.shape_cast %26 : vector<1x4x16xf32> to vector<4x16xf32>
    %28 = arith.truncf %27 : vector<4x16xf32> to vector<4x16xbf16>
    %c0_22 = arith.constant 0 : index
    %c127 = arith.constant 127 : index
    %29 = vector.load %arg4[%c0_22, %c127] : memref<4x512xbf16, #tpu.memory_space<vmem>>, vector<4x16xbf16>
    tpu.vector_store %arg4[%c0_22, %c127], %28 {strides = array<i32>} : memref<4x512xbf16, #tpu.memory_space<vmem>>, vector<4x16xbf16>,
    %c0_23 = arith.constant 0 : index
    %c0_24 = arith.constant 0 : index
    %c112 = arith.constant 112 : index
    %30 = vector.load %arg1[%c0_23, %c0_24, %c112] : memref<1x4x256xf32, #tpu.memory_space<vmem>>, vector<1x4x16xf32>
    %31 = vector.shape_cast %30 : vector<1x4x16xf32> to vector<4x16xf32>
    %32 = arith.truncf %31 : vector<4x16xf32> to vector<4x16xbf16>
    %c0_25 = arith.constant 0 : index
    %c145 = arith.constant 145 : index
    %33 = vector.load %arg4[%c0_25, %c145] : memref<4x512xbf16, #tpu.memory_space<vmem>>, vector<4x16xbf16>
    tpu.vector_store %arg4[%c0_25, %c145], %32 {strides = array<i32>} : memref<4x512xbf16, #tpu.memory_space<vmem>>, vector<4x16xbf16>,
    %c0_26 = arith.constant 0 : index
    %c0_27 = arith.constant 0 : index
    %c128 = arith.constant 128 : index
    %34 = vector.load %arg1[%c0_26, %c0_27, %c128] : memref<1x4x256xf32, #tpu.memory_space<vmem>>, vector<1x4x16xf32>
    %35 = vector.shape_cast %34 : vector<1x4x16xf32> to vector<4x16xf32>
    %36 = arith.truncf %35 : vector<4x16xf32> to vector<4x16xbf16>
    %c0_28 = arith.constant 0 : index
    %c163 = arith.constant 163 : index
    %37 = vector.load %arg4[%c0_28, %c163] : memref<4x512xbf16, #tpu.memory_space<vmem>>, vector<4x16xbf16>
    tpu.vector_store %arg4[%c0_28, %c163], %36 {strides = array<i32>} : memref<4x512xbf16, #tpu.memory_space<vmem>>, vector<4x16xbf16>,
    %c0_29 = arith.constant 0 : index
    %c0_30 = arith.constant 0 : index
    %c144 = arith.constant 144 : index
    %38 = vector.load %arg1[%c0_29, %c0_30, %c144] : memref<1x4x256xf32, #tpu.memory_space<vmem>>, vector<1x4x16xf32>
    %39 = vector.shape_cast %38 : vector<1x4x16xf32> to vector<4x16xf32>
    %40 = arith.truncf %39 : vector<4x16xf32> to vector<4x16xbf16>
    %c0_31 = arith.constant 0 : index
    %c181 = arith.constant 181 : index
    %41 = vector.load %arg4[%c0_31, %c181] : memref<4x512xbf16, #tpu.memory_space<vmem>>, vector<4x16xbf16>
    tpu.vector_store %arg4[%c0_31, %c181], %40 {strides = array<i32>} : memref<4x512xbf16, #tpu.memory_space<vmem>>, vector<4x16xbf16>,
    %c0_32 = arith.constant 0 : index
    %c0_33 = arith.constant 0 : index
    %c160 = arith.constant 160 : index
    %42 = vector.load %arg1[%c0_32, %c0_33, %c160] : memref<1x4x256xf32, #tpu.memory_space<vmem>>, vector<1x4x16xf32>
    %43 = vector.shape_cast %42 : vector<1x4x16xf32> to vector<4x16xf32>
    %44 = arith.truncf %43 : vector<4x16xf32> to vector<4x16xbf16>
    %c0_34 = arith.constant 0 : index
    %c199 = arith.constant 199 : index
    %45 = vector.load %arg4[%c0_34, %c199] : memref<4x512xbf16, #tpu.memory_space<vmem>>, vector<4x16xbf16>
    tpu.vector_store %arg4[%c0_34, %c199], %44 {strides = array<i32>} : memref<4x512xbf16, #tpu.memory_space<vmem>>, vector<4x16xbf16>,
    %c0_35 = arith.constant 0 : index
    %c0_36 = arith.constant 0 : index
    %c176 = arith.constant 176 : index
    %46 = vector.load %arg1[%c0_35, %c0_36, %c176] : memref<1x4x256xf32, #tpu.memory_space<vmem>>, vector<1x4x16xf32>
    %47 = vector.shape_cast %46 : vector<1x4x16xf32> to vector<4x16xf32>
    %48 = arith.truncf %47 : vector<4x16xf32> to vector<4x16xbf16>
    %c0_37 = arith.constant 0 : index
    %c217 = arith.constant 217 : index
    %49 = vector.load %arg4[%c0_37, %c217] : memref<4x512xbf16, #tpu.memory_space<vmem>>, vector<4x16xbf16>
    tpu.vector_store %arg4[%c0_37, %c217], %48 {strides = array<i32>} : memref<4x512xbf16, #tpu.memory_space<vmem>>, vector<4x16xbf16>,
    %c0_38 = arith.constant 0 : index
    %c0_39 = arith.constant 0 : index
    %c192 = arith.constant 192 : index
    %50 = vector.load %arg1[%c0_38, %c0_39, %c192] : memref<1x4x256xf32, #tpu.memory_space<vmem>>, vector<1x4x16xf32>
    %51 = vector.shape_cast %50 : vector<1x4x16xf32> to vector<4x16xf32>
    %52 = arith.truncf %51 : vector<4x16xf32> to vector<4x16xbf16>
    %c0_40 = arith.constant 0 : index
    %c235 = arith.constant 235 : index
    %53 = vector.load %arg4[%c0_40, %c235] : memref<4x512xbf16, #tpu.memory_space<vmem>>, vector<4x16xbf16>
    tpu.vector_store %arg4[%c0_40, %c235], %52 {strides = array<i32>} : memref<4x512xbf16, #tpu.memory_space<vmem>>, vector<4x16xbf16>,
    %c0_41 = arith.constant 0 : index
    %c0_42 = arith.constant 0 : index
    %c208 = arith.constant 208 : index
    %54 = vector.load %arg1[%c0_41, %c0_42, %c208] : memref<1x4x256xf32, #tpu.memory_space<vmem>>, vector<1x4x16xf32>
    %55 = vector.shape_cast %54 : vector<1x4x16xf32> to vector<4x16xf32>
    %56 = arith.truncf %55 : vector<4x16xf32> to vector<4x16xbf16>
    %c0_43 = arith.constant 0 : index
    %c253 = arith.constant 253 : index
    %57 = vector.load %arg4[%c0_43, %c253] : memref<4x512xbf16, #tpu.memory_space<vmem>>, vector<4x16xbf16>
    tpu.vector_store %arg4[%c0_43, %c253], %56 {strides = array<i32>} : memref<4x512xbf16, #tpu.memory_space<vmem>>, vector<4x16xbf16>,
    %c0_44 = arith.constant 0 : index
    %c0_45 = arith.constant 0 : index
    %c224 = arith.constant 224 : index
    %58 = vector.load %arg1[%c0_44, %c0_45, %c224] : memref<1x4x256xf32, #tpu.memory_space<vmem>>, vector<1x4x16xf32>
    %59 = vector.shape_cast %58 : vector<1x4x16xf32> to vector<4x16xf32>
    %60 = arith.truncf %59 : vector<4x16xf32> to vector<4x16xbf16>
    %c0_46 = arith.constant 0 : index
    %c271 = arith.constant 271 : index
    %61 = vector.load %arg4[%c0_46, %c271] : memref<4x512xbf16, #tpu.memory_space<vmem>>, vector<4x16xbf16>
    tpu.vector_store %arg4[%c0_46, %c271], %60 {strides = array<i32>} : memref<4x512xbf16, #tpu.memory_space<vmem>>, vector<4x16xbf16>,
    %c0_47 = arith.constant 0 : index
    %c0_48 = arith.constant 0 : index
    %c240 = arith.constant 240 : index
    %62 = vector.load %arg1[%c0_47, %c0_48, %c240] : memref<1x4x256xf32, #tpu.memory_space<vmem>>, vector<1x4x16xf32>
    %63 = vector.shape_cast %62 : vector<1x4x16xf32> to vector<4x16xf32>
    %64 = arith.truncf %63 : vector<4x16xf32> to vector<4x16xbf16>
    %c0_49 = arith.constant 0 : index
    %c289 = arith.constant 289 : index
    %65 = vector.load %arg4[%c0_49, %c289] : memref<4x512xbf16, #tpu.memory_space<vmem>>, vector<4x16xbf16>
    tpu.vector_store %arg4[%c0_49, %c289], %64 {strides = array<i32>} : memref<4x512xbf16, #tpu.memory_space<vmem>>, vector<4x16xbf16>,
    %c0_50 = arith.constant 0 : index
    %c0_51 = arith.constant 0 : index
    %66 = vector.load %arg4[%c0_50, %c0_51] : memref<4x512xbf16, #tpu.memory_space<vmem>>, vector<4x384xbf16>
    %c0_52 = arith.constant 0 : index
    %c0_53 = arith.constant 0 : index
    %67 = vector.load %arg5[%c0_52, %c0_53] : memref<36x384xbf16, #tpu.memory_space<vmem>>, vector<4x384xbf16>
    tpu.vector_store %arg5[%c0_52, %c0_53], %66 {strides = array<i32>} : memref<36x384xbf16, #tpu.memory_space<vmem>>, vector<4x384xbf16>,
    %c0_54 = arith.constant 0 : index
    %c1 = arith.constant 1 : index
    %68 = vector.load %arg4[%c0_54, %c1] : memref<4x512xbf16, #tpu.memory_space<vmem>>, vector<4x384xbf16>
    %c4 = arith.constant 4 : index
    %c0_55 = arith.constant 0 : index
    %69 = vector.load %arg5[%c4, %c0_55] : memref<36x384xbf16, #tpu.memory_space<vmem>>, vector<4x384xbf16>
    tpu.vector_store %arg5[%c4, %c0_55], %68 {strides = array<i32>} : memref<36x384xbf16, #tpu.memory_space<vmem>>, vector<4x384xbf16>,
    %c0_56 = arith.constant 0 : index
    %c2 = arith.constant 2 : index
    %70 = vector.load %arg4[%c0_56, %c2] : memref<4x512xbf16, #tpu.memory_space<vmem>>, vector<4x384xbf16>
    %c8 = arith.constant 8 : index
    %c0_57 = arith.constant 0 : index
    %71 = vector.load %arg5[%c8, %c0_57] : memref<36x384xbf16, #tpu.memory_space<vmem>>, vector<4x384xbf16>
    tpu.vector_store %arg5[%c8, %c0_57], %70 {strides = array<i32>} : memref<36x384xbf16, #tpu.memory_space<vmem>>, vector<4x384xbf16>,
    %c0_58 = arith.constant 0 : index
    %c18 = arith.constant 18 : index
    %72 = vector.load %arg4[%c0_58, %c18] : memref<4x512xbf16, #tpu.memory_space<vmem>>, vector<4x384xbf16>
    %c12 = arith.constant 12 : index
    %c0_59 = arith.constant 0 : index
    %73 = vector.load %arg5[%c12, %c0_59] : memref<36x384xbf16, #tpu.memory_space<vmem>>, vector<4x384xbf16>
    tpu.vector_store %arg5[%c12, %c0_59], %72 {strides = array<i32>} : memref<36x384xbf16, #tpu.memory_space<vmem>>, vector<4x384xbf16>,
    %c0_60 = arith.constant 0 : index
    %c19_61 = arith.constant 19 : index
    %74 = vector.load %arg4[%c0_60, %c19_61] : memref<4x512xbf16, #tpu.memory_space<vmem>>, vector<4x384xbf16>
    %c16_62 = arith.constant 16 : index
    %c0_63 = arith.constant 0 : index
    %75 = vector.load %arg5[%c16_62, %c0_63] : memref<36x384xbf16, #tpu.memory_space<vmem>>, vector<4x384xbf16>
    tpu.vector_store %arg5[%c16_62, %c0_63], %74 {strides = array<i32>} : memref<36x384xbf16, #tpu.memory_space<vmem>>, vector<4x384xbf16>,
    %c0_64 = arith.constant 0 : index
    %c20 = arith.constant 20 : index
    %76 = vector.load %arg4[%c0_64, %c20] : memref<4x512xbf16, #tpu.memory_space<vmem>>, vector<4x384xbf16>
    %c20_65 = arith.constant 20 : index
    %c0_66 = arith.constant 0 : index
    %77 = vector.load %arg5[%c20_65, %c0_66] : memref<36x384xbf16, #tpu.memory_space<vmem>>, vector<4x384xbf16>
    tpu.vector_store %arg5[%c20_65, %c0_66], %76 {strides = array<i32>} : memref<36x384xbf16, #tpu.memory_space<vmem>>, vector<4x384xbf16>,
    %c0_67 = arith.constant 0 : index
    %c36 = arith.constant 36 : index
    %78 = vector.load %arg4[%c0_67, %c36] : memref<4x512xbf16, #tpu.memory_space<vmem>>, vector<4x384xbf16>
    %c24 = arith.constant 24 : index
    %c0_68 = arith.constant 0 : index
    %79 = vector.load %arg5[%c24, %c0_68] : memref<36x384xbf16, #tpu.memory_space<vmem>>, vector<4x384xbf16>
    tpu.vector_store %arg5[%c24, %c0_68], %78 {strides = array<i32>} : memref<36x384xbf16, #tpu.memory_space<vmem>>, vector<4x384xbf16>,
    %c0_69 = arith.constant 0 : index
    %c37_70 = arith.constant 37 : index
    %80 = vector.load %arg4[%c0_69, %c37_70] : memref<4x512xbf16, #tpu.memory_space<vmem>>, vector<4x384xbf16>
    %c28 = arith.constant 28 : index
    %c0_71 = arith.constant 0 : index
    %81 = vector.load %arg5[%c28, %c0_71] : memref<36x384xbf16, #tpu.memory_space<vmem>>, vector<4x384xbf16>
    tpu.vector_store %arg5[%c28, %c0_71], %80 {strides = array<i32>} : memref<36x384xbf16, #tpu.memory_space<vmem>>, vector<4x384xbf16>,
    %c0_72 = arith.constant 0 : index
    %c38 = arith.constant 38 : index
    %82 = vector.load %arg4[%c0_72, %c38] : memref<4x512xbf16, #tpu.memory_space<vmem>>, vector<4x384xbf16>
    %c32_73 = arith.constant 32 : index
    %c0_74 = arith.constant 0 : index
    %83 = vector.load %arg5[%c32_73, %c0_74] : memref<36x384xbf16, #tpu.memory_space<vmem>>, vector<4x384xbf16>
    tpu.vector_store %arg5[%c32_73, %c0_74], %82 {strides = array<i32>} : memref<36x384xbf16, #tpu.memory_space<vmem>>, vector<4x384xbf16>,
    %c0_75 = arith.constant 0 : index
    %c0_76 = arith.constant 0 : index
    %84 = vector.load %arg2[%c0_75, %c0_76] : memref<8x36xbf16, #tpu.memory_space<vmem>>, vector<8x36xbf16>
    %c0_77 = arith.constant 0 : index
    %c0_78 = arith.constant 0 : index
    %85 = vector.load %arg5[%c0_77, %c0_78] : memref<36x384xbf16, #tpu.memory_space<vmem>>, vector<36x384xbf16>
    %cst_79 = arith.constant dense<0.000000e+00> : vector<8x384xf32>
    %86 = tpu.matmul %84, %85, %cst_79 {dimension_numbers = #tpu.dot_dimension_numbers<[1], [0], [0], [1], [0, 0, 1, 1], [], []>} : vector<8x36xbf16>, vector<36x384xbf16>, vector<8x384xf32> -> vector<8x384xf32>
    %c0_80 = arith.constant 0 : index
    %c0_81 = arith.constant 0 : index
    %87 = vector.load %arg6[%c0_80, %c0_81] : memref<8x384xf32, #tpu.memory_space<vmem>>, vector<8x384xf32>
    tpu.vector_store %arg6[%c0_80, %c0_81], %86 {strides = array<i32>} : memref<8x384xf32, #tpu.memory_space<vmem>>, vector<8x384xf32>,
    %c0_82 = arith.constant 0 : index
    %c0_83 = arith.constant 0 : index
    %88 = vector.load %arg6[%c0_82, %c0_83] : memref<8x384xf32, #tpu.memory_space<vmem>>, vector<8x16xf32>
    %cst_84 = arith.constant 0.000000e+00 : f32
    %89 = vector.broadcast %cst_84 : f32 to vector<8x16xf32>
    %90 = arith.maximumf %88, %89 : vector<8x16xf32>
    %c0_85 = arith.constant 0 : index
    %c0_86 = arith.constant 0 : index
    %c0_87 = arith.constant 0 : index
    %91 = vector.load %arg3[%c0_85, %c0_86, %c0_87] : memref<1x8x256xf32, #tpu.memory_space<vmem>>, vector<1x8x16xf32>
    %92 = vector.shape_cast %91 : vector<1x8x16xf32> to vector<8x16xf32>
    %93 = vector.shape_cast %90 : vector<8x16xf32> to vector<1x8x16xf32>
    tpu.vector_store %arg3[%c0_85, %c0_86, %c0_87], %93 {strides = array<i32>} : memref<1x8x256xf32, #tpu.memory_space<vmem>>, vector<1x8x16xf32>,
    %c0_88 = arith.constant 0 : index
    %c18_89 = arith.constant 18 : index
    %94 = vector.load %arg6[%c0_88, %c18_89] : memref<8x384xf32, #tpu.memory_space<vmem>>, vector<8x16xf32>
    %cst_90 = arith.constant 0.000000e+00 : f32
    %95 = vector.broadcast %cst_90 : f32 to vector<8x16xf32>
    %96 = arith.maximumf %94, %95 : vector<8x16xf32>
    %c0_91 = arith.constant 0 : index
    %c0_92 = arith.constant 0 : index
    %c16_93 = arith.constant 16 : index
    %97 = vector.load %arg3[%c0_91, %c0_92, %c16_93] : memref<1x8x256xf32, #tpu.memory_space<vmem>>, vector<1x8x16xf32>
    %98 = vector.shape_cast %97 : vector<1x8x16xf32> to vector<8x16xf32>
    %99 = vector.shape_cast %96 : vector<8x16xf32> to vector<1x8x16xf32>
    tpu.vector_store %arg3[%c0_91, %c0_92, %c16_93], %99 {strides = array<i32>} : memref<1x8x256xf32, #tpu.memory_space<vmem>>, vector<1x8x16xf32>,
    %c0_94 = arith.constant 0 : index
    %c36_95 = arith.constant 36 : index
    %100 = vector.load %arg6[%c0_94, %c36_95] : memref<8x384xf32, #tpu.memory_space<vmem>>, vector<8x16xf32>
    %cst_96 = arith.constant 0.000000e+00 : f32
    %101 = vector.broadcast %cst_96 : f32 to vector<8x16xf32>
    %102 = arith.maximumf %100, %101 : vector<8x16xf32>
    %c0_97 = arith.constant 0 : index
    %c0_98 = arith.constant 0 : index
    %c32_99 = arith.constant 32 : index
    %103 = vector.load %arg3[%c0_97, %c0_98, %c32_99] : memref<1x8x256xf32, #tpu.memory_space<vmem>>, vector<1x8x16xf32>
    %104 = vector.shape_cast %103 : vector<1x8x16xf32> to vector<8x16xf32>
    %105 = vector.shape_cast %102 : vector<8x16xf32> to vector<1x8x16xf32>
    tpu.vector_store %arg3[%c0_97, %c0_98, %c32_99], %105 {strides = array<i32>} : memref<1x8x256xf32, #tpu.memory_space<vmem>>, vector<1x8x16xf32>,
    %c0_100 = arith.constant 0 : index
    %c54 = arith.constant 54 : index
    %106 = vector.load %arg6[%c0_100, %c54] : memref<8x384xf32, #tpu.memory_space<vmem>>, vector<8x16xf32>
    %cst_101 = arith.constant 0.000000e+00 : f32
    %107 = vector.broadcast %cst_101 : f32 to vector<8x16xf32>
    %108 = arith.maximumf %106, %107 : vector<8x16xf32>
    %c0_102 = arith.constant 0 : index
    %c0_103 = arith.constant 0 : index
    %c48_104 = arith.constant 48 : index
    %109 = vector.load %arg3[%c0_102, %c0_103, %c48_104] : memref<1x8x256xf32, #tpu.memory_space<vmem>>, vector<1x8x16xf32>
    %110 = vector.shape_cast %109 : vector<1x8x16xf32> to vector<8x16xf32>
    %111 = vector.shape_cast %108 : vector<8x16xf32> to vector<1x8x16xf32>
    tpu.vector_store %arg3[%c0_102, %c0_103, %c48_104], %111 {strides = array<i32>} : memref<1x8x256xf32, #tpu.memory_space<vmem>>, vector<1x8x16xf32>,
    %c0_105 = arith.constant 0 : index
    %c72 = arith.constant 72 : index
    %112 = vector.load %arg6[%c0_105, %c72] : memref<8x384xf32, #tpu.memory_space<vmem>>, vector<8x16xf32>
    %cst_106 = arith.constant 0.000000e+00 : f32
    %113 = vector.broadcast %cst_106 : f32 to vector<8x16xf32>
    %114 = arith.maximumf %112, %113 : vector<8x16xf32>
    %c0_107 = arith.constant 0 : index
    %c0_108 = arith.constant 0 : index
    %c64_109 = arith.constant 64 : index
    %115 = vector.load %arg3[%c0_107, %c0_108, %c64_109] : memref<1x8x256xf32, #tpu.memory_space<vmem>>, vector<1x8x16xf32>
    %116 = vector.shape_cast %115 : vector<1x8x16xf32> to vector<8x16xf32>
    %117 = vector.shape_cast %114 : vector<8x16xf32> to vector<1x8x16xf32>
    tpu.vector_store %arg3[%c0_107, %c0_108, %c64_109], %117 {strides = array<i32>} : memref<1x8x256xf32, #tpu.memory_space<vmem>>, vector<1x8x16xf32>,
    %c0_110 = arith.constant 0 : index
    %c90 = arith.constant 90 : index
    %118 = vector.load %arg6[%c0_110, %c90] : memref<8x384xf32, #tpu.memory_space<vmem>>, vector<8x16xf32>
    %cst_111 = arith.constant 0.000000e+00 : f32
    %119 = vector.broadcast %cst_111 : f32 to vector<8x16xf32>
    %120 = arith.maximumf %118, %119 : vector<8x16xf32>
    %c0_112 = arith.constant 0 : index
    %c0_113 = arith.constant 0 : index
    %c80_114 = arith.constant 80 : index
    %121 = vector.load %arg3[%c0_112, %c0_113, %c80_114] : memref<1x8x256xf32, #tpu.memory_space<vmem>>, vector<1x8x16xf32>
    %122 = vector.shape_cast %121 : vector<1x8x16xf32> to vector<8x16xf32>
    %123 = vector.shape_cast %120 : vector<8x16xf32> to vector<1x8x16xf32>
    tpu.vector_store %arg3[%c0_112, %c0_113, %c80_114], %123 {strides = array<i32>} : memref<1x8x256xf32, #tpu.memory_space<vmem>>, vector<1x8x16xf32>,
    %c0_115 = arith.constant 0 : index
    %c108 = arith.constant 108 : index
    %124 = vector.load %arg6[%c0_115, %c108] : memref<8x384xf32, #tpu.memory_space<vmem>>, vector<8x16xf32>
    %cst_116 = arith.constant 0.000000e+00 : f32
    %125 = vector.broadcast %cst_116 : f32 to vector<8x16xf32>
    %126 = arith.maximumf %124, %125 : vector<8x16xf32>
    %c0_117 = arith.constant 0 : index
    %c0_118 = arith.constant 0 : index
    %c96_119 = arith.constant 96 : index
    %127 = vector.load %arg3[%c0_117, %c0_118, %c96_119] : memref<1x8x256xf32, #tpu.memory_space<vmem>>, vector<1x8x16xf32>
    %128 = vector.shape_cast %127 : vector<1x8x16xf32> to vector<8x16xf32>
    %129 = vector.shape_cast %126 : vector<8x16xf32> to vector<1x8x16xf32>
    tpu.vector_store %arg3[%c0_117, %c0_118, %c96_119], %129 {strides = array<i32>} : memref<1x8x256xf32, #tpu.memory_space<vmem>>, vector<1x8x16xf32>,
    %c0_120 = arith.constant 0 : index
    %c126 = arith.constant 126 : index
    %130 = vector.load %arg6[%c0_120, %c126] : memref<8x384xf32, #tpu.memory_space<vmem>>, vector<8x16xf32>
    %cst_121 = arith.constant 0.000000e+00 : f32
    %131 = vector.broadcast %cst_121 : f32 to vector<8x16xf32>
    %132 = arith.maximumf %130, %131 : vector<8x16xf32>
    %c0_122 = arith.constant 0 : index
    %c0_123 = arith.constant 0 : index
    %c112_124 = arith.constant 112 : index
    %133 = vector.load %arg3[%c0_122, %c0_123, %c112_124] : memref<1x8x256xf32, #tpu.memory_space<vmem>>, vector<1x8x16xf32>
    %134 = vector.shape_cast %133 : vector<1x8x16xf32> to vector<8x16xf32>
    %135 = vector.shape_cast %132 : vector<8x16xf32> to vector<1x8x16xf32>
    tpu.vector_store %arg3[%c0_122, %c0_123, %c112_124], %135 {strides = array<i32>} : memref<1x8x256xf32, #tpu.memory_space<vmem>>, vector<1x8x16xf32>,
    %c0_125 = arith.constant 0 : index
    %c144_126 = arith.constant 144 : index
    %136 = vector.load %arg6[%c0_125, %c144_126] : memref<8x384xf32, #tpu.memory_space<vmem>>, vector<8x16xf32>
    %cst_127 = arith.constant 0.000000e+00 : f32
    %137 = vector.broadcast %cst_127 : f32 to vector<8x16xf32>
    %138 = arith.maximumf %136, %137 : vector<8x16xf32>
    %c0_128 = arith.constant 0 : index
    %c0_129 = arith.constant 0 : index
    %c128_130 = arith.constant 128 : index
    %139 = vector.load %arg3[%c0_128, %c0_129, %c128_130] : memref<1x8x256xf32, #tpu.memory_space<vmem>>, vector<1x8x16xf32>
    %140 = vector.shape_cast %139 : vector<1x8x16xf32> to vector<8x16xf32>
    %141 = vector.shape_cast %138 : vector<8x16xf32> to vector<1x8x16xf32>
    tpu.vector_store %arg3[%c0_128, %c0_129, %c128_130], %141 {strides = array<i32>} : memref<1x8x256xf32, #tpu.memory_space<vmem>>, vector<1x8x16xf32>,
    %c0_131 = arith.constant 0 : index
    %c162 = arith.constant 162 : index
    %142 = vector.load %arg6[%c0_131, %c162] : memref<8x384xf32, #tpu.memory_space<vmem>>, vector<8x16xf32>
    %cst_132 = arith.constant 0.000000e+00 : f32
    %143 = vector.broadcast %cst_132 : f32 to vector<8x16xf32>
    %144 = arith.maximumf %142, %143 : vector<8x16xf32>
    %c0_133 = arith.constant 0 : index
    %c0_134 = arith.constant 0 : index
    %c144_135 = arith.constant 144 : index
    %145 = vector.load %arg3[%c0_133, %c0_134, %c144_135] : memref<1x8x256xf32, #tpu.memory_space<vmem>>, vector<1x8x16xf32>
    %146 = vector.shape_cast %145 : vector<1x8x16xf32> to vector<8x16xf32>
    %147 = vector.shape_cast %144 : vector<8x16xf32> to vector<1x8x16xf32>
    tpu.vector_store %arg3[%c0_133, %c0_134, %c144_135], %147 {strides = array<i32>} : memref<1x8x256xf32, #tpu.memory_space<vmem>>, vector<1x8x16xf32>,
    %c0_136 = arith.constant 0 : index
    %c180 = arith.constant 180 : index
    %148 = vector.load %arg6[%c0_136, %c180] : memref<8x384xf32, #tpu.memory_space<vmem>>, vector<8x16xf32>
    %cst_137 = arith.constant 0.000000e+00 : f32
    %149 = vector.broadcast %cst_137 : f32 to vector<8x16xf32>
    %150 = arith.maximumf %148, %149 : vector<8x16xf32>
    %c0_138 = arith.constant 0 : index
    %c0_139 = arith.constant 0 : index
    %c160_140 = arith.constant 160 : index
    %151 = vector.load %arg3[%c0_138, %c0_139, %c160_140] : memref<1x8x256xf32, #tpu.memory_space<vmem>>, vector<1x8x16xf32>
    %152 = vector.shape_cast %151 : vector<1x8x16xf32> to vector<8x16xf32>
    %153 = vector.shape_cast %150 : vector<8x16xf32> to vector<1x8x16xf32>
    tpu.vector_store %arg3[%c0_138, %c0_139, %c160_140], %153 {strides = array<i32>} : memref<1x8x256xf32, #tpu.memory_space<vmem>>, vector<1x8x16xf32>,
    %c0_141 = arith.constant 0 : index
    %c198 = arith.constant 198 : index
    %154 = vector.load %arg6[%c0_141, %c198] : memref<8x384xf32, #tpu.memory_space<vmem>>, vector<8x16xf32>
    %cst_142 = arith.constant 0.000000e+00 : f32
    %155 = vector.broadcast %cst_142 : f32 to vector<8x16xf32>
    %156 = arith.maximumf %154, %155 : vector<8x16xf32>
    %c0_143 = arith.constant 0 : index
    %c0_144 = arith.constant 0 : index
    %c176_145 = arith.constant 176 : index
    %157 = vector.load %arg3[%c0_143, %c0_144, %c176_145] : memref<1x8x256xf32, #tpu.memory_space<vmem>>, vector<1x8x16xf32>
    %158 = vector.shape_cast %157 : vector<1x8x16xf32> to vector<8x16xf32>
    %159 = vector.shape_cast %156 : vector<8x16xf32> to vector<1x8x16xf32>
    tpu.vector_store %arg3[%c0_143, %c0_144, %c176_145], %159 {strides = array<i32>} : memref<1x8x256xf32, #tpu.memory_space<vmem>>, vector<1x8x16xf32>,
    %c0_146 = arith.constant 0 : index
    %c216 = arith.constant 216 : index
    %160 = vector.load %arg6[%c0_146, %c216] : memref<8x384xf32, #tpu.memory_space<vmem>>, vector<8x16xf32>
    %cst_147 = arith.constant 0.000000e+00 : f32
    %161 = vector.broadcast %cst_147 : f32 to vector<8x16xf32>
    %162 = arith.maximumf %160, %161 : vector<8x16xf32>
    %c0_148 = arith.constant 0 : index
    %c0_149 = arith.constant 0 : index
    %c192_150 = arith.constant 192 : index
    %163 = vector.load %arg3[%c0_148, %c0_149, %c192_150] : memref<1x8x256xf32, #tpu.memory_space<vmem>>, vector<1x8x16xf32>
    %164 = vector.shape_cast %163 : vector<1x8x16xf32> to vector<8x16xf32>
    %165 = vector.shape_cast %162 : vector<8x16xf32> to vector<1x8x16xf32>
    tpu.vector_store %arg3[%c0_148, %c0_149, %c192_150], %165 {strides = array<i32>} : memref<1x8x256xf32, #tpu.memory_space<vmem>>, vector<1x8x16xf32>,
    %c0_151 = arith.constant 0 : index
    %c234 = arith.constant 234 : index
    %166 = vector.load %arg6[%c0_151, %c234] : memref<8x384xf32, #tpu.memory_space<vmem>>, vector<8x16xf32>
    %cst_152 = arith.constant 0.000000e+00 : f32
    %167 = vector.broadcast %cst_152 : f32 to vector<8x16xf32>
    %168 = arith.maximumf %166, %167 : vector<8x16xf32>
    %c0_153 = arith.constant 0 : index
    %c0_154 = arith.constant 0 : index
    %c208_155 = arith.constant 208 : index
    %169 = vector.load %arg3[%c0_153, %c0_154, %c208_155] : memref<1x8x256xf32, #tpu.memory_space<vmem>>, vector<1x8x16xf32>
    %170 = vector.shape_cast %169 : vector<1x8x16xf32> to vector<8x16xf32>
    %171 = vector.shape_cast %168 : vector<8x16xf32> to vector<1x8x16xf32>
    tpu.vector_store %arg3[%c0_153, %c0_154, %c208_155], %171 {strides = array<i32>} : memref<1x8x256xf32, #tpu.memory_space<vmem>>, vector<1x8x16xf32>,
    %c0_156 = arith.constant 0 : index
    %c252 = arith.constant 252 : index
    %172 = vector.load %arg6[%c0_156, %c252] : memref<8x384xf32, #tpu.memory_space<vmem>>, vector<8x16xf32>
    %cst_157 = arith.constant 0.000000e+00 : f32
    %173 = vector.broadcast %cst_157 : f32 to vector<8x16xf32>
    %174 = arith.maximumf %172, %173 : vector<8x16xf32>
    %c0_158 = arith.constant 0 : index
    %c0_159 = arith.constant 0 : index
    %c224_160 = arith.constant 224 : index
    %175 = vector.load %arg3[%c0_158, %c0_159, %c224_160] : memref<1x8x256xf32, #tpu.memory_space<vmem>>, vector<1x8x16xf32>
    %176 = vector.shape_cast %175 : vector<1x8x16xf32> to vector<8x16xf32>
    %177 = vector.shape_cast %174 : vector<8x16xf32> to vector<1x8x16xf32>
    tpu.vector_store %arg3[%c0_158, %c0_159, %c224_160], %177 {strides = array<i32>} : memref<1x8x256xf32, #tpu.memory_space<vmem>>, vector<1x8x16xf32>,
    %c0_161 = arith.constant 0 : index
    %c270 = arith.constant 270 : index
    %178 = vector.load %arg6[%c0_161, %c270] : memref<8x384xf32, #tpu.memory_space<vmem>>, vector<8x16xf32>
    %cst_162 = arith.constant 0.000000e+00 : f32
    %179 = vector.broadcast %cst_162 : f32 to vector<8x16xf32>
    %180 = arith.maximumf %178, %179 : vector<8x16xf32>
    %c0_163 = arith.constant 0 : index
    %c0_164 = arith.constant 0 : index
    %c240_165 = arith.constant 240 : index
    %181 = vector.load %arg3[%c0_163, %c0_164, %c240_165] : memref<1x8x256xf32, #tpu.memory_space<vmem>>, vector<1x8x16xf32>
    %182 = vector.shape_cast %181 : vector<1x8x16xf32> to vector<8x16xf32>
    %183 = vector.shape_cast %180 : vector<8x16xf32> to vector<1x8x16xf32>
    tpu.vector_store %arg3[%c0_163, %c0_164, %c240_165], %183 {strides = array<i32>} : memref<1x8x256xf32, #tpu.memory_space<vmem>>, vector<1x8x16xf32>,
    return
  }
  func.func @transform_0(%arg0: i32) -> (i32, i32, i32) {
    %c0_i32 = arith.constant 0 : i32
    %c0_i32_0 = arith.constant 0 : i32
    %c0_i32_1 = arith.constant 0 : i32
    return %arg0, %c0_i32, %c0_i32_0 : i32, i32, i32
  }
  func.func @transform_1(%arg0: i32) -> (i32, i32) {
    %c0_i32 = arith.constant 0 : i32
    %c0_i32_0 = arith.constant 0 : i32
    %c0_i32_1 = arith.constant 0 : i32
    return %c0_i32, %c0_i32_0 : i32, i32
  }
  func.func @transform_2(%arg0: i32) -> (i32, i32, i32) {
    %c0_i32 = arith.constant 0 : i32
    %c0_i32_0 = arith.constant 0 : i32
    %c0_i32_1 = arith.constant 0 : i32
    return %arg0, %c0_i32, %c0_i32_0 : i32, i32, i32
  }
}

</mosaic_0001>

<bundles_post_ra>
// kernel: conv_relu_forward.1
= control target key start
LH: loop header
LB: loop body
LE: loop exit
PB: predicated region body
PF: predicated region fallthrough
CT: control target
= control target key end

     0   :  { %s1166_s9 = smov 0   ;;  %s1284_s0 = inlined_call_operand.vmem [shape: f32[2,4,256], index: 0, kind: input, shape index: {}]   ;;  %s1285_s1 = inlined_call_operand.vmem [shape: bf16[8,36], index: 1, kind: input, shape index: {}]   ;;  %s1286_s2 = inlined_call_operand.vmem [shape: f32[2,8,256], index: 2, kind: output, shape index: {}]  }
   0x1 LB: > { %s1000_s10 = sadd.s32 4294967295, %s1109_s9   ;;  %p1004_p0 = scmp.ge.s32.totalorder %s1109_s9, 1  ;;  %s1109_s9 = sphi %s1166_s9, %s12_s9  }
   0x2   : > { %p112_p1 = scmp.lt.s32.totalorder %s1109_s9, 3 }
   0x4   : > { %p113_p2 = pnand %p1004_p0, %p112_p1 }
   0x5   : > { %p134_p3 = scmp.lt.s32.totalorder (!%p113_p2), %s1000_s10, 1  ;;  %v152_v0 = vlaneseq (!%p113_p2)  ;;  %v1111_v1 = vmov (!%p113_p2), 1983009808   ;;  %v1112_v3 = vmov (!%p113_p2), 0   ;;  %s1113_s15 = smov (!%p113_p2), 23   ;;  %vm159_vm0 = vcmask (!%p113_p2), 279704  }
   0x6   : > { %116 = sbr.rel (%p113_p2) target bundleno = 697 (0x2b9), region = 28  ;;  %v150_v2 = vunpack.c.l.s4 (!%p113_p2), %v1111_v1  ;;  %145 = vst [vmem:[#allocation2] sm:$0xff] (!%p113_p2), %v1112_v3  ;;  %763 = vmatprep.mubr.bf16.mxu0 (!%p113_p2), %v1112_v3  ;;  %s1114_s16 = smov (!%p113_p2), 19   ;;  %vm174_vm1 = vcmask (!%p113_p2), 427304   ;;  %vm189_vm2 = vcmask (!%p113_p2), 574904   ;;  %vm204_vm3 = vcmask (!%p113_p2), 722504  }
   0x7   : > { %v153_v4 = vshrl.u32 (!%p113_p2), %v152_v0, 7  ;;  %s1115_s17 = smov (!%p113_p2), 25   ;;  %s1116_s18 = smov (!%p113_p2), 21   ;;  %vm219_vm4 = vcmask (!%p113_p2), 870104   ;;  %vm252_vm5 = vcmask (!%p113_p2), 1042424   ;;  %vm253_vm6 = vcmask (!%p113_p2), 117762  }
   0x8   : > { %v151_v5 = vunpack.c.0.s8 (!%p113_p2), %v150_v2  ;;  %s1117_s19 = smov (!%p113_p2), 27   ;;  %s1118_s20 = smov (!%p113_p2), 31   ;;  %vm249_vm7 = vcmask (!%p113_p2), 252928   ;;  %vm234_vm8 = vcmask (!%p113_p2), 1017704   ;;  %vm254_vm9 = vmor (!%p113_p2), %vm253_vm6, %vm252_vm5  ;;  %vm269_vm10 = vcmask (!%p113_p2), 263304  }
   0x9   : > { %s1119_s21 = smov (!%p113_p2), 33   ;;  %s1120_s22 = smov (!%p113_p2), 29   ;;  %vm284_vm11 = vcmask (!%p113_p2), 410904   ;;  %vm299_vm12 = vcmask (!%p113_p2), 558504   ;;  %vm314_vm13 = vcmask (!%p113_p2), 706104   ;;  %vm362_vm14 = vcmask (!%p113_p2), 1042408  }
   0xa   : > { %v1182_v6 = vsub.s32 (!%p113_p2), %v151_v5, %v153_v4  ;;  %s1121_s23 = smov (!%p113_p2), 37   ;;  %s1122_s24 = smov (!%p113_p2), 35   ;;  %vm363_vm15 = vcmask (!%p113_p2), 101378   ;;  %vm394_vm5 = vcmask (!%p113_p2), 394504   ;;  %vm1138_vm6 = vmmov (!%p113_p2), 0  }
   0xb   : > { %s1123_s25 = smov (!%p113_p2), 45   ;;  %s1124_s26 = smov (!%p113_p2), 39  }
   0xc   : > { %s1125_s27 = smov (!%p113_p2), 41   ;;  %s1126_s28 = smov (!%p113_p2), 43  }
   0xd   : > { %s1288_s10 = smov (!%p134_p3, %s1000_s10), 1  ;;  %s1127_s29 = smov 47  }
   0xe   : > { %s1025_s11 = sshll.u32 %s1288_s10, 3  ;;  %s1128_s30 = smov 49  }
   0xf   : > { %s1180_s14 = scalar_lea.vmem %s1284_s0, %s1025_s11  ;;  %s1129_s3 = smov 126  }
  0x10   : > { %v176_v7 = vld [vmem:[%s1180_s14] sm:$0xf]  ;;  %v286_v29 = vld [vmem:[%s1180_s14 + $0x4] sm:$0xf]  ;;  %s1130_s4 = smov 127   ;;  %s1131_s5 = smov 109  }
  0x11   : > { %v146_v8 = vld [vmem:[%s1180_s14] sm:$0xf]  ;;  %v177_v10 = vpack.c.bf16 %v176_v7, %v176_v7  ;;  %v271_v30 = vld [vmem:[%s1180_s14 + $0x4] sm:$0xf]  ;;  %v287_v33 = vpack.c.bf16 %v286_v29, %v286_v29  ;;  %s1132_s6 = smov 110   ;;  %s1133_s7 = smov 92  }
  0x12   : > { %v191_v9 = vld [vmem:[%s1180_s14] sm:$0xf]  ;;  %v147_v11 = vpack.c.bf16 %v146_v8, %v146_v8  ;;  %v272_v34 = vpack.c.bf16 %v271_v30, %v271_v30  ;;  %v346_v35 = vld [vmem:[%s1180_s14 + $0x4] sm:$0xf]  ;;  %s1134_s8 = smov 108   ;;  %s1135_s11 = smov 91  }
  0x13   : > { %v192_v12 = vpack.c.bf16 %v191_v9, %v191_v9  ;;  %v161_v13 = vld [vmem:[%s1180_s14] sm:$0xf]  ;;  %v185_v17 = vrot.slane %v177_v10, %v1182_v6  ;;  %v301_v36 = vld [vmem:[%s1180_s14 + $0x4] sm:$0xf]  ;;  %v347_v37 = vpack.c.bf16 %v346_v35, %v346_v35  ;;  %v295_v38 = vrot.slane %v287_v33, %v1182_v6  ;;  %s1137_s12 = smov 90  }
  0x14   : > { %v206_v14 = vld [vmem:[%s1180_s14] sm:$0xf]  ;;  %v162_v15 = vpack.c.bf16 %v161_v13, %v161_v13  ;;  %v155_v18 = vrot.slane %v147_v11, %v1182_v6  ;;  %v280_v39 = vrot.slane %v272_v34, %v1182_v6  ;;  %v302_v40 = vpack.c.bf16 %v301_v36, %v301_v36  ;;  %v316_v41 = vld [vmem:[%s1180_s14 + $0x4] sm:$0xf] }
  0x15   : > { %v236_v16 = vld [vmem:[%s1180_s14] sm:$0xf]  ;;  %v207_v19 = vpack.c.bf16 %v206_v14, %v206_v14  ;;  %186 = vrot.lane.b32.xlu1 %v185_v17, %s1113_s15  ;;  %v200_v20 = vrot.slane %v192_v12, %v1182_v6  ;;  %v331_v42 = vld [vmem:[%s1180_s14 + $0x4] sm:$0xf]  ;;  %v317_v43 = vpack.c.bf16 %v316_v41, %v316_v41  ;;  %v355_v44 = vrot.slane %v347_v37, %v1182_v6  ;;  %s1026_s15 = sshll.u32 %s1288_s10, 4  ;;  %s1140_s10 = smov 114  }
  0x16   : > { %156 = vrot.lane.b32.xlu0 %v155_v18, %s1114_s16  ;;  %v170_v21 = vrot.slane %v162_v15, %v1182_v6  ;;  %v237_v22 = vpack.c.bf16 %v236_v16, %v236_v16  ;;  %v256_v23 = vld [vmem:[%s1180_s14] sm:$0xf]  ;;  %v310_v45 = vrot.slane %v302_v40, %v1182_v6  ;;  %v332_v46 = vpack.c.bf16 %v331_v42, %v331_v42  ;;  %v366_v47 = vld [vmem:[%s1180_s14 + $0x4] sm:$0xf] }
  0x17   : > { %v221_v24 = vld [vmem:[%s1180_s14] sm:$0xf]  ;;  %v257_v25 = vpack.c.bf16 %v256_v23, %v256_v23  ;;  %v215_v26 = vrot.slane %v207_v19, %v1182_v6  ;;  %v381_v48 = vld [vmem:[%s1180_s14 + $0x4] sm:$0xf]  ;;  %v367_v49 = vpack.c.bf16 %v366_v47, %v366_v47  ;;  %v325_v50 = vrot.slane %v317_v43, %v1182_v6 }
  0x18   : > { %v245_v27 = vrot.slane %v237_v22, %v1182_v6  ;;  %v222_v28 = vpack.c.bf16 %v221_v24, %v221_v24  ;;  %v340_v51 = vrot.slane %v332_v46, %v1182_v6  ;;  %v382_v52 = vpack.c.bf16 %v381_v48, %v381_v48 }
  0x19   : > { %201 = vrot.lane.b32.xlu1 %v200_v20, %s1115_s17  ;;  %v265_v31 = vrot.slane %v257_v25, %v1182_v6  ;;  %v375_v53 = vrot.slane %v367_v49, %v1182_v6  ;;  %v1136_v20 = vmov 0.0  }
  0x1a   : > { %171 = vrot.lane.b32.xlu0 %v170_v21, %s1116_s18  ;;  %v230_v32 = vrot.slane %v222_v28, %v1182_v6  ;;  %v390_v54 = vrot.slane %v382_v52, %v1182_v6  ;;  %1031 = vmatprep.subr.bf16.mxu1 %v1136_v20  ;;  %s1254_s18 = scalar_lea.vmem %s1286_s2, %s1026_s15 }
  0x1b   : > { %1037 = vmatprep.mubr.msk.bf16.mxu1 %vm1138_vm6, %v1136_v20  ;;  %vm849_vm6 = vcmask 654848  }
  0x1d   : > { %216 = vrot.lane.b32.xlu1 %v215_v26, %s1117_s19  ;;  %s1139_s19 = smov 100  }
  0x1e   : > { %246 = vrot.lane.b32.xlu0 %v245_v27, %s1118_s20  ;;  %s1141_s20 = smov 124  }
  0x21   : > { %266 = vrot.lane.b32.xlu1 %v265_v31, %s1119_s21  ;;  %s1142_s21 = smov 112  }
  0x22   : > { %231 = vrot.lane.b32.xlu0 %v230_v32, %s1120_s22  ;;  %s1143_s22 = smov 122  }
  0x25   : > { %296 = vrot.lane.b32.xlu1 %v295_v38, %s1121_s23  ;;  %s1144_s23 = smov 120  }
  0x26   : > { %281 = vrot.lane.b32.xlu0 %v280_v39, %s1122_s24  ;;  %s1145_s24 = smov 118  }
  0x29   : > { %356 = vrot.lane.b32.xlu1 %v355_v44, %s1123_s25  ;;  %s1146_s25 = smov 106  }
  0x2a   : > { %311 = vrot.lane.b32.xlu0 %v310_v45, %s1124_s26  ;;  %s1147_s26 = smov 116  }
  0x2d   : > { %341 = vrot.lane.b32.xlu1 %v340_v51, %s1126_s28  ;;  %s1149_s28 = smov 102  }
  0x2e   : > { %326 = vrot.lane.b32.xlu0 %v325_v50, %s1125_s27  ;;  %s1148_s27 = smov 104  }
  0x31   : > { %391 = vrot.lane.b32.xlu1 %v390_v54, %s1128_s30 }
  0x32   : > { %376 = vrot.lane.b32.xlu0 %v375_v53, %s1127_s29  ;;  %s1150_s29 = smov 98  }
  0x87   : > { %v187_v55 = vpop.permute.xlu1 %186 }
  0x88   : > { %v157_v56 = vpop.permute.xlu0 %156 }
  0x89   : > { %160 = vst.msk [vmem:[#allocation2] sm:$0x3] %vm159_vm0, %v157_v56  ;;  %vm329_vm0 = vcmask 853704  }
  0x8b   : > { %v202_v57 = vpop.permute.xlu1 %201 }
  0x8c   : > { %v172_v58 = vpop.permute.xlu0 %171 }
  0x8d   : > { %175 = vst.msk [vmem:[#allocation2] sm:$0x3] %vm174_vm1, %v172_v58  ;;  %vm359_vm1 = vcmask 367616  }
  0x8e   : > { %190 = vst.msk [vmem:[#allocation2] sm:$0x3] %vm189_vm2, %v187_v55  ;;  %vm344_vm2 = vcmask 1001304  }
  0x8f   : > { %205 = vst.msk [vmem:[#allocation2] sm:$0x3] %vm204_vm3, %v202_v57  ;;  %v217_v59 = vpop.permute.xlu1 %216  ;;  %vm364_vm3 = vmor %vm363_vm15, %vm362_vm14  ;;  %vm597_vm14 = vcmask 752640   ;;  %vm659_vm15 = vcmask 736256  }
  0x90   : > { %v247_v60 = vpop.permute.xlu0 %246  ;;  %220 = vst.msk [vmem:[#allocation2] sm:$0x3] %vm219_vm4, %v217_v59  ;;  %vm379_vm4 = vcmask 246904  }
  0x91   : > { %v248_v61 = vrot.slane %v247_v60, 6 }
  0x93   : > { %v267_v62 = vpop.permute.xlu1 %266  ;;  %v250_v0 = vsel %vm249_vm7, %v248_v61, %v247_v60  ;;  %vm442_vm7 = vcmask 1039360  }
  0x94   : > { %v232_v63 = vpop.permute.xlu0 %231 }
  0x95   : > { %235 = vst.msk [vmem:[#allocation2] sm:$0x3] %vm234_vm8, %v232_v63  ;;  %vm504_vm8 = vcmask 900096  }
  0x96   : > { %255 = vst.msk [vmem:[#allocation2] sm:$0xf] %vm254_vm9, %v250_v0  ;;  %vm566_vm9 = vcmask 883712  }
  0x97   : > { %270 = vst.msk [vmem:[#allocation2 + $0x2] sm:$0x3] %vm269_vm10, %v267_v62  ;;  %v297_v1 = vpop.permute.xlu1 %296  ;;  %vm628_vm10 = vcmask 744448  }
  0x98   : > { %v282_v2 = vpop.permute.xlu0 %281 }
  0x99   : > { %285 = vst.msk [vmem:[#allocation2 + $0x2] sm:$0x3] %vm284_vm11, %v282_v2  ;;  %vm440_vm11 = vcmask 1043456  }
  0x9a   : > { %300 = vst.msk [vmem:[#allocation2 + $0x2] sm:$0x3] %vm299_vm12, %v297_v1  ;;  %vm473_vm12 = vcmask 1031168  }
  0x9b   : > { %v357_v3 = vpop.permute.xlu1 %356 }
  0x9c   : > { %v312_v4 = vpop.permute.xlu0 %311  ;;  %v358_v5 = vrot.slane %v357_v3, 6 }
  0x9d   : > { %315 = vst.msk [vmem:[#allocation2 + $0x2] sm:$0x3] %vm314_vm13, %v312_v4  ;;  %vm535_vm13 = vcmask 891904  }
  0x9e   : > { %v360_v9 = vsel %vm359_vm1, %v358_v5, %v357_v3  ;;  %vm717_vm1 = vcmask 293888  }
  0x9f   : > { %v342_v8 = vpop.permute.xlu1 %341 }
  0xa0   : > { %v327_v7 = vpop.permute.xlu0 %326 }
  0xa1   : > { %330 = vst.msk [vmem:[#allocation2 + $0x2] sm:$0x3] %vm329_vm0, %v327_v7  ;;  %vm721_vm0 = vcmask 1041408  }
  0xa2   : > { %345 = vst.msk [vmem:[#allocation2 + $0x2] sm:$0x3] %vm344_vm2, %v342_v8  ;;  %vm817_vm2 = vcmask 130048  }
  0xa3   : > { %365 = vst.msk [vmem:[#allocation2 + $0x2] sm:$0xf] %vm364_vm3, %v360_v9  ;;  %v392_v11 = vpop.permute.xlu1 %391  ;;  %vm825_vm3 = vcmask 261248  }
  0xa4   : > { %v377_v10 = vpop.permute.xlu0 %376 }
  0xa5   : > { %380 = vst.msk [vmem:[#allocation2 + $0x4] sm:$0x3] %vm379_vm4, %v377_v10  ;;  %vm833_vm4 = vcmask 392448  }
  0xa6   : > { %395 = vst.msk [vmem:[#allocation2 + $0x4] sm:$0x3] %vm394_vm5, %v392_v11  ;;  %vm841_vm5 = vcmask 523648  }
  0xad   : > { %v396_v12 = vld [vmem:[#allocation2] sm:$0x3f] }
  0xae   : > { %v449_v13 = vld [vmem:[#allocation2] sm:$0xff]  ;;  %v398_v14 = vcombine.high %v396_v12, %v396_v12  ;;  %1009 = vst.sshfl [vmem:[#allocation3] sm:$0xf pattern:$0x76325410] %v396_v12 }
  0xaf   : > { %v458_v15 = vrot.slane %v449_v13, %v1182_v6  ;;  %v419_v16 = vcombine.low %v449_v13, %v449_v13  ;;  %v451_v18 = vcombine.high %v449_v13, %v449_v13 }
  0xb0   : > { %1010 = vst.sshfl [vmem:[#allocation3 + $0x8] sm:$0x3 pattern:$0x76325410] %v398_v14 }
  0xb1   : > { %466 = vrot.lane.b32.xlu0 %v458_v15, %s1129_s3  ;;  %436 = vrot.lane.b32.xlu1 %v458_v15, %s1130_s4  ;;  %v426_v17 = vrot.slane %v419_v16, %v1182_v6  ;;  %v465_v19 = vrot.slane %v451_v18, %v1182_v6 }
  0xb5   : > { %528 = vrot.lane.b32.xlu0 %v458_v15, %s1131_s5  ;;  %499 = vrot.lane.b32.xlu1 %v458_v15, %s1132_s6 }
  0xb9   : > { %590 = vrot.lane.b32.xlu0 %v458_v15, %s1133_s7  ;;  %561 = vrot.lane.b32.xlu1 %v458_v15, %s1134_s8 }
  0xbd   : > { %623 = vrot.lane.b32.xlu1 %v458_v15, %s1135_s11  ;;  %434 = vrot.lane.b32.xlu0 %v426_v17, %s1130_s4 }
  0xc1   : > { %468 = vrot.lane.b32.xlu1 %v465_v19, %s1129_s3  ;;  %497 = vrot.lane.b32.xlu0 %v426_v17, %s1132_s6 }
  0xc5   : > { %530 = vrot.lane.b32.xlu1 %v465_v19, %s1131_s5  ;;  %559 = vrot.lane.b32.xlu0 %v426_v17, %s1134_s8 }
  0xc9   : > { %592 = vrot.lane.b32.xlu1 %v465_v19, %s1133_s7  ;;  %621 = vrot.lane.b32.xlu0 %v426_v17, %s1135_s11 }
  0xcd   : > { %654 = vrot.lane.b32.xlu1 %v465_v19, %s1137_s12  ;;  %652 = vrot.lane.b32.xlu0 %v458_v15, %s1137_s12 }
 0x123   : > { %v467_v21 = vpop.permute.xlu0 %466  ;;  %v437_v6 = vpop.permute.xlu1 %436 }
 0x124   : > { %v439_v22 = vrot.slane %v437_v6, 4  ;;  %v470_v41 = vrot.slane %v467_v21, 4 }
 0x126   : > { %v444_v23 = vsel %vm442_vm7, %v437_v6, %v439_v22 }
 0x127   : > { %448 = vst [vmem:[#allocation3 + $0x8] sm:$0xc] %v444_v23  ;;  %v529_v24 = vpop.permute.xlu0 %528  ;;  %v500_v25 = vpop.permute.xlu1 %499 }
 0x128   : > { %v502_v26 = vrot.slane %v500_v25, 4  ;;  %v532_v51 = vrot.slane %v529_v24, 4 }
 0x12a   : > { %v506_v27 = vsel %vm504_vm8, %v500_v25, %v502_v26 }
 0x12b   : > { %510 = vst [vmem:[#allocation3 + $0x14] sm:$0xc] %v506_v27  ;;  %v591_v28 = vpop.permute.xlu0 %590  ;;  %v562_v29 = vpop.permute.xlu1 %561 }
 0x12c   : > { %v564_v30 = vrot.slane %v562_v29, 4  ;;  %v594_v61 = vrot.slane %v591_v28, 4 }
 0x12e   : > { %v568_v31 = vsel %vm566_vm9, %v562_v29, %v564_v30 }
 0x12f   : > { %572 = vst [vmem:[#allocation3 + $0x20] sm:$0xc] %v568_v31  ;;  %v624_v32 = vpop.permute.xlu1 %623  ;;  %v435_v33 = vpop.permute.xlu0 %434 }
 0x130   : > { %v626_v34 = vrot.slane %v624_v32, 4  ;;  %v438_v35 = vrot.slane %v435_v33, 4 }
 0x132   : > { %v630_v36 = vsel %vm628_vm10, %v624_v32, %v626_v34  ;;  %v441_v37 = vsel %vm440_vm11, %v438_v35, %v439_v22 }
 0x133   : > { %634 = vst [vmem:[#allocation3 + $0x2c] sm:$0xc] %v630_v36  ;;  %v443_v38 = vsel %vm442_vm7, %v435_v33, %v441_v37  ;;  %v469_v39 = vpop.permute.xlu1 %468  ;;  %v498_v40 = vpop.permute.xlu0 %497  ;;  %vm857_vm7 = vcmask 786048  }
 0x134   : > { %447 = vst [vmem:[#allocation3] sm:$0xcc] %v443_v38  ;;  %v471_v42 = vrot.slane %v469_v39, 4  ;;  %v501_v43 = vrot.slane %v498_v40, 4 }
 0x136   : > { %v472_v44 = vsel %vm440_vm11, %v470_v41, %v471_v42  ;;  %v475_v45 = vsel %vm473_vm12, %v469_v39, %v471_v42  ;;  %v503_v46 = vsel %vm440_vm11, %v501_v43, %v502_v26 }
 0x137   : > { %v474_v47 = vsel %vm473_vm12, %v467_v21, %v472_v44  ;;  %479 = vst [vmem:[#allocation3 + $0x14] sm:$0x3] %v475_v45  ;;  %v505_v48 = vsel %vm504_vm8, %v498_v40, %v503_v46  ;;  %v531_v49 = vpop.permute.xlu1 %530  ;;  %v560_v50 = vpop.permute.xlu0 %559  ;;  %vm865_vm8 = vcmask 917248  }
 0x138   : > { %478 = vst [vmem:[#allocation3 + $0xc] sm:$0x33] %v474_v47  ;;  %509 = vst [vmem:[#allocation3 + $0xc] sm:$0xcc] %v505_v48  ;;  %v533_v52 = vrot.slane %v531_v49, 4  ;;  %v563_v53 = vrot.slane %v560_v50, 4 }
 0x13a   : > { %v534_v54 = vsel %vm440_vm11, %v532_v51, %v533_v52  ;;  %v537_v55 = vsel %vm535_vm13, %v531_v49, %v533_v52  ;;  %v565_v56 = vsel %vm440_vm11, %v563_v53, %v564_v30 }
 0x13b   : > { %v536_v57 = vsel %vm535_vm13, %v529_v24, %v534_v54  ;;  %541 = vst [vmem:[#allocation3 + $0x20] sm:$0x3] %v537_v55  ;;  %v567_v58 = vsel %vm566_vm9, %v560_v50, %v565_v56  ;;  %v593_v59 = vpop.permute.xlu1 %592  ;;  %v622_v60 = vpop.permute.xlu0 %621  ;;  %v666_v24 = vld [vmem:[%s1285_s1] sm:$0xf]  ;;  %vm934_vm9 = vcmask 818176  }
 0x13c   : > { %540 = vst [vmem:[#allocation3 + $0x18] sm:$0x33] %v536_v57  ;;  %571 = vst [vmem:[#allocation3 + $0x18] sm:$0xcc] %v567_v58  ;;  %v595_v62 = vrot.slane %v593_v59, 4  ;;  %v625_v63 = vrot.slane %v622_v60, 4 }
 0x13e   : > { %v596_v0 = vsel %vm440_vm11, %v594_v61, %v595_v62  ;;  %v599_v1 = vsel %vm597_vm14, %v593_v59, %v595_v62  ;;  %v627_v2 = vsel %vm440_vm11, %v625_v63, %v626_v34  ;;  %v1092_v3 = vld [vmem:[#allocation3 + $0x8] ss:$12 sps:$4 sm:$0xff]  }
 0x13f   : > { %v598_v4 = vsel %vm597_vm14, %v591_v28, %v596_v0  ;;  %603 = vst [vmem:[#allocation3 + $0x2c] sm:$0x3] %v599_v1  ;;  %v629_v5 = vsel %vm628_vm10, %v622_v60, %v627_v2  ;;  %v655_v7 = vpop.permute.xlu1 %654  ;;  %v653_v8 = vpop.permute.xlu0 %652  ;;  %v1093_v9 = vld [vmem:[#allocation3 + $0x4] ss:$12 sps:$4 sm:$0xff]   ;;  %v1095_v10 = vld [vmem:[#allocation3] ss:$12 sps:$4 sm:$0xff]   ;;  %1032 = vmatpush3.bf16.msra.mxu1 %v1092_v3 }
 0x140   : > { %602 = vst [vmem:[#allocation3 + $0x24] sm:$0x33] %v598_v4  ;;  %633 = vst [vmem:[#allocation3 + $0x24] sm:$0xcc] %v629_v5  ;;  %v657_v11 = vrot.slane %v655_v7, 4  ;;  %v656_v12 = vrot.slane %v653_v8, 4  ;;  %731 = vmatprep.subr.bf16.mxu0 %v1093_v9  ;;  %1033 = vmatprep.subr.bf16.mxu1 %v1136_v20 }
 0x141   : > { %732 = vmatpush1.bf16.msra.mxu0 %v1095_v10  ;;  %vm877_vm10 = vcmask 932864  }
 0x142   : > { %v661_v13 = vsel %vm659_vm15, %v655_v7, %v657_v11  ;;  %v658_v14 = vsel %vm440_vm11, %v656_v12, %v657_v11  ;;  %vm880_vm11 = vcmask 1048448  }
 0x143   : > { %665 = vst [vmem:[#allocation3 + $0x38] sm:$0x3] %v661_v13  ;;  %v660_v15 = vsel %vm659_vm15, %v653_v8, %v658_v14 }
 0x144   : > { %664 = vst [vmem:[#allocation3 + $0x30] sm:$0x33] %v660_v15 }
 0x146   : > { %v1096_v16 = vld [vmem:[#allocation3 + $0x20] ss:$12 sps:$4 sm:$0xff]  }
 0x147   : > { %v1097_v17 = vld [vmem:[#allocation3 + $0x1c] ss:$12 sps:$4 sm:$0xff]   ;;  %v1099_v18 = vld [vmem:[#allocation3 + $0x18] ss:$12 sps:$4 sm:$0xff]   ;;  %1034 = vmatpush3.bf16.msra.mxu1 %v1096_v16 }
 0x148   : > { %733 = vmatprep.subr.bf16.mxu0 %v1097_v17  ;;  %1035 = vmatprep.subr.bf16.mxu1 %v1136_v20 }
 0x149   : > { %734 = vmatpush1.bf16.msra.mxu0 %v1099_v18 }
 0x14a   : > { %v1101_v19 = vld [vmem:[#allocation3 + $0x38] ss:$0 sps:$4 sm:$0x33]  }
 0x14b   : > { %v675_v21 = vld [vmem:[#allocation3 + $0x30] sm:$0x33]  ;;  %v729_v22 = vsel %vm721_vm0, %v1101_v19, 0 }
 0x14c   : > { %v1018_v6 = vcombine.high %v675_v21, %v675_v21  ;;  %v1017_v23 = vcombine.low %v675_v21, %v675_v21  ;;  %1036 = vmatpush3.bf16.msra.mxu1 %v729_v22 }
 0x14e   : > { %1020 = vmatprep.subr.msk.bf16.mxu0 %vm721_vm0, %v1018_v6  ;;  %v723_v25 = vsel %vm721_vm0, %v1017_v23, 0 }
 0x14f   : > { %736 = vmatpush1.bf16.msra.mxu0 %v723_v25  ;;  %1038 = vmatmul.mubr.msk.bf16.vlgmr.msra.gmra.mrb[0].mxu1 %vm717_vm1, %v666_v24 }
 0x152   : > { %1021 = vmatmul.mubr.msk.bf16.vlgmr.msra.gmra.mrb[0].mxu0 %vm717_vm1, %v666_v24 }
 0x222   : > { %v806_v20 = vpop.f32.mrb[0].mxu1 }
 0x223   : > { %v927_v26 = vmax.f32 %v806_v20, 0.0  ;;  %v1039_v27 = vpop.f32.mrb[1].mxu1 }
 0x224   : > { %v809_v29 = vpop.f32.mrb[2].mxu1 }
 0x225   : > { %v765_v28 = vpop.f32.mrb[0].mxu0  ;;  %932 = vrot.lane.b32.xlu0 %v927_v26, %s1139_s19  ;;  %v1040_v32 = vpop.f32.mrb[3].mxu1 }
 0x226   : > { %v816_v30 = vmax.f32 %v765_v28, 0.0  ;;  %v767_v31 = vpop.f32.mrb[1].mxu0 }
 0x227   : > { %v769_v33 = vpop.f32.mrb[2].mxu0  ;;  %v870_v35 = vmax.f32 %v767_v31, 0.0 }
 0x228   : > { %822 = vrot.lane.b32.xlu1 %v816_v30, %s1129_s3  ;;  %v770_v34 = vpop.f32.mrb[3].mxu0  ;;  %818 = vst.msk [vmem:[%s1254_s18] sm:$0xff] %vm817_vm2, %v816_v30 }
 0x229   : > { %873 = vrot.lane.b32.xlu0 %v816_v30, %s1140_s10 }
 0x22c   : > { %830 = vrot.lane.b32.xlu1 %v816_v30, %s1141_s20 }
 0x22d   : > { %885 = vrot.lane.b32.xlu0 %v870_v35, %s1142_s21 }
 0x230   : > { %838 = vrot.lane.b32.xlu1 %v816_v30, %s1143_s22 }
 0x231   : > { %892 = vrot.lane.b32.xlu0 %v870_v35, %s1132_s6 }
 0x234   : > { %846 = vrot.lane.b32.xlu1 %v816_v30, %s1144_s23 }
 0x235   : > { %899 = vrot.lane.b32.xlu0 %v870_v35, %s1134_s8 }
 0x238   : > { %854 = vrot.lane.b32.xlu1 %v816_v30, %s1145_s24 }
 0x239   : > { %906 = vrot.lane.b32.xlu0 %v870_v35, %s1146_s25 }
 0x23c   : > { %862 = vrot.lane.b32.xlu1 %v816_v30, %s1147_s26 }
 0x23d   : > { %913 = vrot.lane.b32.xlu0 %v870_v35, %s1148_s27 }
 0x240   : > { %930 = vrot.lane.b32.xlu1 %v870_v35, %s1139_s19 }
 0x241   : > { %920 = vrot.lane.b32.xlu0 %v870_v35, %s1149_s28 }
 0x244   : > { %875 = vrot.lane.b32.xlu1 %v870_v35, %s1140_s10 }
 0x245   : > { %941 = vrot.lane.b32.xlu0 %v927_v26, %s1150_s29 }
 0x297   : > { %v933_v36 = vpop.permute.xlu0 %932 }
 0x29a   : > { %v823_v37 = vpop.permute.xlu1 %822 }
 0x29b   : > { %826 = vst.msk [vmem:[%s1254_s18] sm:$0xff] %vm825_vm3, %v823_v37  ;;  %v874_v38 = vpop.permute.xlu0 %873 }
 0x29e   : > { %v831_v39 = vpop.permute.xlu1 %830 }
 0x29f   : > { %834 = vst.msk [vmem:[%s1254_s18] sm:$0xff] %vm833_vm4, %v831_v39  ;;  %v886_v40 = vpop.permute.xlu0 %885 }
 0x2a0   : > { %888 = vst.msk [vmem:[%s1254_s18 + $0x8] sm:$0xff] %vm817_vm2, %v886_v40 }
 0x2a2   : > { %v839_v41 = vpop.permute.xlu1 %838 }
 0x2a3   : > { %842 = vst.msk [vmem:[%s1254_s18] sm:$0xff] %vm841_vm5, %v839_v41  ;;  %v893_v42 = vpop.permute.xlu0 %892 }
 0x2a4   : > { %895 = vst.msk [vmem:[%s1254_s18 + $0x8] sm:$0xff] %vm825_vm3, %v893_v42 }
 0x2a6   : > { %v847_v43 = vpop.permute.xlu1 %846 }
 0x2a7   : > { %850 = vst.msk [vmem:[%s1254_s18] sm:$0xff] %vm849_vm6, %v847_v43  ;;  %v900_v44 = vpop.permute.xlu0 %899 }
 0x2a8   : > { %902 = vst.msk [vmem:[%s1254_s18 + $0x8] sm:$0xff] %vm833_vm4, %v900_v44 }
 0x2aa   : > { %v855_v45 = vpop.permute.xlu1 %854 }
 0x2ab   : > { %858 = vst.msk [vmem:[%s1254_s18] sm:$0xff] %vm857_vm7, %v855_v45  ;;  %v907_v46 = vpop.permute.xlu0 %906 }
 0x2ac   : > { %909 = vst.msk [vmem:[%s1254_s18 + $0x8] sm:$0xff] %vm841_vm5, %v907_v46 }
 0x2ae   : > { %v863_v47 = vpop.permute.xlu1 %862 }
 0x2af   : > { %866 = vst.msk [vmem:[%s1254_s18] sm:$0xff] %vm865_vm8, %v863_v47  ;;  %v914_v48 = vpop.permute.xlu0 %913 }
 0x2b0   : > { %916 = vst.msk [vmem:[%s1254_s18 + $0x8] sm:$0xff] %vm849_vm6, %v914_v48 }
 0x2b2   : > { %v931_v49 = vpop.permute.xlu1 %930 }
 0x2b3   : > { %v921_v50 = vpop.permute.xlu0 %920  ;;  %v935_v51 = vsel %vm934_vm9, %v931_v49, %v933_v36 }
 0x2b4   : > { %923 = vst.msk [vmem:[%s1254_s18 + $0x8] sm:$0xff] %vm857_vm7, %v921_v50 }
 0x2b5   : > { %937 = vst.msk [vmem:[%s1254_s18 + $0x8] sm:$0xff] %vm865_vm8, %v935_v51 }
 0x2b6   : > { %v876_v52 = vpop.permute.xlu1 %875 }
 0x2b7   : > { %v878_v53 = vsel %vm877_vm10, %v874_v38, %v876_v52  ;;  %v942_v54 = vpop.permute.xlu0 %941 }
 0x2b8   : > { %881 = vst.msk [vmem:[%s1254_s18] sm:$0xff] %vm880_vm11, %v878_v53  ;;  %944 = vst.msk [vmem:[%s1254_s18 + $0x8] sm:$0xff] %vm880_vm11, %v942_v54 }
 0x2b9 PF: > { %s12_s9 = sadd.s32 1, %s1109_s9  }
 0x2ba   : > { %p9_p4 = scmp.ge.s32.totalorder %s12_s9, 4  }
 0x2bc   :  { %11 = sbr.rel (!%p9_p4) target bundleno = 1 (0x1), region = 58 }

</bundles_post_ra>
